<compile_context>
chip_gen: v5e
topology: v5e:2x2
jax: 0.10.0
libtpu: 0.0.40
codegen_flags: <defaults>
</compile_context>

<pallas_src>
import functools

import jax
import jax.numpy as jnp
from jax.experimental import pallas as pl
from jax.experimental.pallas import tpu as pltpu

NEURON = 64      # hidden width of conv1/2/3
ATT_HID = 16     # attention1 width
_MAX_ROWS_PER_BLOCK = 8192   # cap TB*N so f32 activation slabs stay comfortably inside VMEM


def _round_up(v, m):
    return (v + m - 1) // m * m


def _mlp_structural_kernel(xin_ref, w1c_ref, w2_ref, w3_ref, wa1_ref, wa2_ref, bias_ref,
                           o_ref, *, num_nodes, aggregator):
    """One grid step == TB graphs. xin block (TB, N, x_s+Fc), out block (TB, ys)."""
    TB, N, F = xin_ref.shape
    ys = o_ref.shape[-1]
    M = TB * N

    xin = xin_ref[...].reshape(M, F)                                  # bf16 (TB*N, x_s+Fc)

    # Fused conv1 + closeness_layer: [x | cf] @ [[w1, 0], [0, wc]] + [b1 | bc]
    z1 = jnp.dot(xin, w1c_ref[...], preferred_element_type=jnp.float32)
    z1 = z1 + bias_ref[0:1, :NEURON + 1]
    h = jnp.maximum(z1[:, :NEURON], 0.0)                              # conv1 + ReLU
    c = z1[:, NEURON:NEURON + 1]                                      # (M, 1) closeness logits

    # conv2, conv3 (bf16 operands, f32 accumulate)
    h = jnp.maximum(jnp.dot(h.astype(jnp.bfloat16), w2_ref[...],
                            preferred_element_type=jnp.float32)
                    + bias_ref[1:2, :NEURON], 0.0)
    h = jnp.maximum(jnp.dot(h.astype(jnp.bfloat16), w3_ref[...],
                            preferred_element_type=jnp.float32)
                    + bias_ref[2:3, :NEURON], 0.0)                    # (M, NEURON)

    # Per-graph softmax-attention pooling with deferred normalization.
    # (M,1)->(TB,N,1) and (M,64)->(TB,N,64) are leading-dim splits (free when N % 8 == 0).
    c = c.reshape(TB, N, 1)
    e = jnp.exp(c - jnp.max(c, axis=1, keepdims=True))                # (TB, N, 1), > 0
    inv = pl.reciprocal(jnp.sum(e, axis=1), approx=True)              # (TB, 1) = 1/sum_e

    weighted = e * h.reshape(TB, N, NEURON)                           # (TB, N, NEURON), >= 0
    if aggregator == "self_max":
        # max_n(softmax_n * N * h_n) == (N / sum_e) * max_n(e_n * h_n)   since h >= 0
        att = jnp.max(weighted, axis=1) * (inv * jnp.float32(num_nodes))
    elif aggregator == "self_average":
        # mean_n(softmax_n * N * h_n) == (1 / sum_e) * sum_n(e_n * h_n)  (N cancels)
        att = jnp.sum(weighted, axis=1) * inv
    else:
        raise NotImplementedError("Error in aggregator!")             # (TB, NEURON)

    # attention1 + ReLU, then attention2
    a1 = jnp.maximum(jnp.dot(att.astype(jnp.bfloat16), wa1_ref[...],
                             preferred_element_type=jnp.float32)
                     + bias_ref[3:4, :ATT_HID], 0.0)
    out = jnp.dot(a1.astype(jnp.bfloat16), wa2_ref[...],
                  preferred_element_type=jnp.float32) + bias_ref[4:5, :ys]
    o_ref[...] = out.astype(o_ref.dtype)                              # (TB, ys)


def mlp_net_structural(x, closeness, params, *, aggregator="self_max",
                       graphs_per_block=512):
    """x: (B, N, x_s) f32, closeness: (B, N, Fc) f32 -> (B, ys) f32."""
    if aggregator not in ("self_max", "self_average"):
        raise NotImplementedError("Error in aggregator!")

    B, N, x_s = x.shape
    Fc = closeness.shape[-1]
    ys = params["wa2"].shape[-1]

    # ---- host-side packing -------------------------------------------------
    # single fused/bf16 node-feature input [x | cf]
    xin = jnp.concatenate([x, closeness], axis=-1).astype(jnp.bfloat16)   # (B, N, x_s+Fc)

    # fused first-layer weight  [[w1, 0], [0, wc]]  of shape (x_s+Fc, NEURON+1)
    w1c = jnp.zeros((x_s + Fc, NEURON + 1), jnp.float32)
    w1c = w1c.at[:x_s, :NEURON].set(params["w1"]).at[x_s:, NEURON:].set(params["wc"])

    # bias slab (f32, added after the f32 accumulation)
    slab_w = max(128, _round_up(max(NEURON + 1, ys), 128))
    bias = jnp.zeros((8, slab_w), jnp.float32)
    bias = bias.at[0, :NEURON].set(params["b1"][0]).at[0, NEURON].set(params["bc"][0, 0])
    bias = bias.at[1, :NEURON].set(params["b2"][0])
    bias = bias.at[2, :NEURON].set(params["b3"][0])
    bias = bias.at[3, :ATT_HID].set(params["ba1"][0])
    bias = bias.at[4, :ys].set(params["ba2"][0])

    weights = [w1c.astype(jnp.bfloat16),
               params["w2"].astype(jnp.bfloat16),
               params["w3"].astype(jnp.bfloat16),
               params["wa1"].astype(jnp.bfloat16),
               params["wa2"].astype(jnp.bfloat16)]

    # ---- batch tiling ------------------------------------------------------
    tb_cap = max(8, (_MAX_ROWS_PER_BLOCK // max(N, 1)) // 8 * 8)
    tb = min(graphs_per_block, tb_cap, _round_up(B, 8))
    tb = max(8, tb // 8 * 8)
    # keep >= 2 grid steps for big-enough batches so v7x's second TensorCore gets work
    if tb >= B and B > 16:
        tb = max(8, _round_up((B + 1) // 2, 8))
    Bp = _round_up(B, tb)
    if Bp != B:
        xin = jnp.pad(xin, ((0, Bp - B), (0, 0), (0, 0)))
    grid = (Bp // tb,)

    kernel = functools.partial(_mlp_structural_kernel,
                               num_nodes=N, aggregator=aggregator)

    def const_spec(arr):
        nd = arr.ndim
        return pl.BlockSpec(arr.shape, lambda b, _nd=nd: (0,) * _nd)

    out = pl.pallas_call(
        kernel,
        out_shape=jax.ShapeDtypeStruct((Bp, ys), jnp.float32),
        grid_spec=pltpu.PrefetchScalarGridSpec(
            num_scalar_prefetch=0,
            grid=grid,
            in_specs=[pl.BlockSpec((tb, N, x_s + Fc), lambda b: (b, 0, 0))]
                     + [const_spec(w) for w in weights]
                     + [const_spec(bias)],
            out_specs=pl.BlockSpec((tb, ys), lambda b: (b, 0)),
        ),
        compiler_params=pltpu.CompilerParams(
            dimension_semantics=("parallel",),
            vmem_limit_bytes=32 * 1024 * 1024,
        ),
    )(xin, *weights, bias)
    return out[:B]


def _reference(x, closeness, params, *, aggregator="self_max"):
    """Pure-JAX f32 reference of the same forward semantics (for verification)."""
    B, N, _ = x.shape
    outs = []
    for b in range(B):
        h = jnp.maximum(x[b] @ params["w1"] + params["b1"], 0.0)
        h = jnp.maximum(h @ params["w2"] + params["b2"], 0.0)
        h = jnp.maximum(h @ params["w3"] + params["b3"], 0.0)
        c = closeness[b] @ params["wc"] + params["bc"]
        c = jax.nn.softmax(c, axis=0) * N
        w = c * h
        if aggregator == "self_max":
            att = jnp.max(w, axis=0)
        else:
            att = jnp.mean(w, axis=0)
        a1 = jnp.maximum(att @ params["wa1"] + params["ba1"][0], 0.0)
        outs.append(a1 @ params["wa2"] + params["ba2"][0])
    return jnp.stack(outs, axis=0)


def init_params(key, x_s, att_feat, ys=1):
    """Deterministic synthetic parameters (Linear weights stored as [in, out])."""
    ks = jax.random.split(key, 7)

    def lin(k, fan_in, fan_out):
        scale = 1.0 / jnp.sqrt(jnp.float32(fan_in))
        w = jax.random.uniform(k, (fan_in, fan_out), jnp.float32, -scale, scale)
        b = jax.random.uniform(jax.random.fold_in(k, 1), (1, fan_out), jnp.float32,
                               -scale, scale)
        return w, b

    w1, b1 = lin(ks[0], x_s, NEURON)
    w2, b2 = lin(ks[1], NEURON, NEURON)
    w3, b3 = lin(ks[2], NEURON, NEURON)
    wc, bc = lin(ks[3], att_feat, 1)
    wa1, ba1 = lin(ks[4], NEURON, ATT_HID)
    wa2, ba2 = lin(ks[5], ATT_HID, ys)
    return dict(w1=w1, b1=b1, w2=w2, b2=b2, w3=w3, b3=b3,
                wc=wc, bc=bc, wa1=wa1, ba1=ba1, wa2=wa2, ba2=ba2)


if __name__ == "__main__":
    X_S = 32        # node feature dim (x_s)
    ATT_FEAT = 4    # args.attention_num_feature
    YS = 1          # output dim

    key = jax.random.PRNGKey(0)
    kx, kc, kp, kx2, kc2 = jax.random.split(key, 5)
    params = init_params(kp, X_S, ATT_FEAT, YS)

    # case 1: small batch, self_max (single grid step)
    B, N = 4, 8
    x = jax.random.normal(kx, (B, N, X_S), jnp.float32)
    closeness = jax.random.normal(kc, (B, N, ATT_FEAT), jnp.float32)
    out = jax.block_until_ready(
        mlp_net_structural(x, closeness, params, aggregator="self_max"))
    ref = _reference(x, closeness, params, aggregator="self_max")
    assert out.shape == (B, YS), out.shape
    assert jnp.allclose(out, ref, atol=5e-2, rtol=5e-2), (out, ref)

    # case 2: multi-block grid + batch padding + self_average branch
    B2 = 20
    x2 = jax.random.normal(kx2, (B2, N, X_S), jnp.float32)
    closeness2 = jax.random.normal(kc2, (B2, N, ATT_FEAT), jnp.float32)
    out2 = jax.block_until_ready(
        mlp_net_structural(x2, closeness2, params,
                           aggregator="self_average", graphs_per_block=8))
    ref2 = _reference(x2, closeness2, params, aggregator="self_average")
    assert out2.shape == (B2, YS), out2.shape
    assert jnp.allclose(out2, ref2, atol=5e-2, rtol=5e-2), (out2, ref2)

    print("KERNEL_OK")
</pallas_src>

<mosaic_0001>
module attributes {stable_mosaic.version = 11 : i64} {
  func.func @_mlp_structural_kernel(%arg0: i32, %arg1: memref<8x8x36xbf16, #tpu.memory_space<vmem>>, %arg2: memref<36x65xbf16, #tpu.memory_space<vmem>>, %arg3: memref<64x64xbf16, #tpu.memory_space<vmem>>, %arg4: memref<64x64xbf16, #tpu.memory_space<vmem>>, %arg5: memref<64x16xbf16, #tpu.memory_space<vmem>>, %arg6: memref<16x1xbf16, #tpu.memory_space<vmem>>, %arg7: memref<8x128xf32, #tpu.memory_space<vmem>>, %arg8: memref<8x1xf32, #tpu.memory_space<vmem>>) attributes {dimension_semantics = [#tpu.dimension_semantics<parallel>], iteration_bounds = array<i64: 1>, scalar_prefetch = 0 : i64, scratch_operands = 0 : i64, tpu.core_type = #tpu.core_type<tc>, window_params = [{transform_indices = @transform_0, window_bounds = array<i64: 8, 8, 36>}, {pipeline_mode = #tpu.pipeline_mode<synchronous>, transform_indices = @transform_1, window_bounds = array<i64: 36, 65>}, {pipeline_mode = #tpu.pipeline_mode<synchronous>, transform_indices = @transform_2, window_bounds = array<i64: 64, 64>}, {pipeline_mode = #tpu.pipeline_mode<synchronous>, transform_indices = @transform_3, window_bounds = array<i64: 64, 64>}, {pipeline_mode = #tpu.pipeline_mode<synchronous>, transform_indices = @transform_4, window_bounds = array<i64: 64, 16>}, {pipeline_mode = #tpu.pipeline_mode<synchronous>, transform_indices = @transform_5, window_bounds = array<i64: 16, 1>}, {pipeline_mode = #tpu.pipeline_mode<synchronous>, transform_indices = @transform_6, window_bounds = array<i64: 8, 128>}, {transform_indices = @transform_7, window_bounds = array<i64: 8, 1>}]} {
    %c0 = arith.constant 0 : index
    %c0_0 = arith.constant 0 : index
    %c0_1 = arith.constant 0 : index
    %0 = vector.load %arg1[%c0, %c0_0, %c0_1] : memref<8x8x36xbf16, #tpu.memory_space<vmem>>, vector<8x8x36xbf16>
    %1 = vector.shape_cast %0 : vector<8x8x36xbf16> to vector<64x36xbf16>
    %c0_2 = arith.constant 0 : index
    %c0_3 = arith.constant 0 : index
    %2 = vector.load %arg2[%c0_2, %c0_3] : memref<36x65xbf16, #tpu.memory_space<vmem>>, vector<36x65xbf16>
    %cst = arith.constant dense<0.000000e+00> : vector<64x65xf32>
    %3 = tpu.matmul %1, %2, %cst {dimension_numbers = #tpu.dot_dimension_numbers<[1], [0], [0], [1], [0, 0, 1, 1], [], []>} : vector<64x36xbf16>, vector<36x65xbf16>, vector<64x65xf32> -> vector<64x65xf32>
    %c0_4 = arith.constant 0 : index
    %c0_5 = arith.constant 0 : index
    %4 = vector.load %arg7[%c0_4, %c0_5] : memref<8x128xf32, #tpu.memory_space<vmem>>, vector<1x65xf32>
    %5 = vector.broadcast %4 : vector<1x65xf32> to vector<64x65xf32>
    %6 = arith.addf %3, %5 : vector<64x65xf32>
    %7 = vector.extract_strided_slice %6 {offsets = [0, 0], sizes = [64, 64], strides = [1, 1]} : vector<64x65xf32> to vector<64x64xf32>
    %cst_6 = arith.constant 0.000000e+00 : f32
    %8 = vector.broadcast %cst_6 : f32 to vector<64x64xf32>
    %9 = arith.maximumf %7, %8 : vector<64x64xf32>
    %10 = vector.extract_strided_slice %6 {offsets = [0, 64], sizes = [64, 1], strides = [1, 1]} : vector<64x65xf32> to vector<64x1xf32>
    %11 = arith.truncf %9 : vector<64x64xf32> to vector<64x64xbf16>
    %c0_7 = arith.constant 0 : index
    %c0_8 = arith.constant 0 : index
    %12 = vector.load %arg3[%c0_7, %c0_8] : memref<64x64xbf16, #tpu.memory_space<vmem>>, vector<64x64xbf16>
    %cst_9 = arith.constant dense<0.000000e+00> : vector<64x64xf32>
    %13 = tpu.matmul %11, %12, %cst_9 {dimension_numbers = #tpu.dot_dimension_numbers<[1], [0], [0], [1], [0, 0, 1, 1], [], []>} : vector<64x64xbf16>, vector<64x64xbf16>, vector<64x64xf32> -> vector<64x64xf32>
    %c1 = arith.constant 1 : index
    %c0_10 = arith.constant 0 : index
    %14 = vector.load %arg7[%c1, %c0_10] : memref<8x128xf32, #tpu.memory_space<vmem>>, vector<1x64xf32>
    %15 = vector.broadcast %14 : vector<1x64xf32> to vector<64x64xf32>
    %16 = arith.addf %13, %15 : vector<64x64xf32>
    %cst_11 = arith.constant 0.000000e+00 : f32
    %17 = vector.broadcast %cst_11 : f32 to vector<64x64xf32>
    %18 = arith.maximumf %16, %17 : vector<64x64xf32>
    %19 = arith.truncf %18 : vector<64x64xf32> to vector<64x64xbf16>
    %c0_12 = arith.constant 0 : index
    %c0_13 = arith.constant 0 : index
    %20 = vector.load %arg4[%c0_12, %c0_13] : memref<64x64xbf16, #tpu.memory_space<vmem>>, vector<64x64xbf16>
    %cst_14 = arith.constant dense<0.000000e+00> : vector<64x64xf32>
    %21 = tpu.matmul %19, %20, %cst_14 {dimension_numbers = #tpu.dot_dimension_numbers<[1], [0], [0], [1], [0, 0, 1, 1], [], []>} : vector<64x64xbf16>, vector<64x64xbf16>, vector<64x64xf32> -> vector<64x64xf32>
    %c2 = arith.constant 2 : index
    %c0_15 = arith.constant 0 : index
    %22 = vector.load %arg7[%c2, %c0_15] : memref<8x128xf32, #tpu.memory_space<vmem>>, vector<1x64xf32>
    %23 = vector.broadcast %22 : vector<1x64xf32> to vector<64x64xf32>
    %24 = arith.addf %21, %23 : vector<64x64xf32>
    %cst_16 = arith.constant 0.000000e+00 : f32
    %25 = vector.broadcast %cst_16 : f32 to vector<64x64xf32>
    %26 = arith.maximumf %24, %25 : vector<64x64xf32>
    %27 = vector.shape_cast %10 : vector<64x1xf32> to vector<8x8x1xf32>
    %cst_17 = arith.constant dense<0xFF800000> : vector<8x1xf32>
    %28 = vector.multi_reduction <maximumf>, %27, %cst_17 [1] : vector<8x8x1xf32> to vector<8x1xf32>
    %29 = vector.shape_cast %28 : vector<8x1xf32> to vector<8x1x1xf32>
    %30 = vector.broadcast %29 : vector<8x1x1xf32> to vector<8x8x1xf32>
    %31 = arith.subf %27, %30 : vector<8x8x1xf32>
    %32 = math.exp %31 : vector<8x8x1xf32>
    %cst_18 = arith.constant dense<0.000000e+00> : vector<8x1xf32>
    %33 = vector.multi_reduction <add>, %32, %cst_18 [1] : vector<8x8x1xf32> to vector<8x1xf32>
    %34 = tpu.reciprocal %33 {approx = true} : vector<8x1xf32> -> vector<8x1xf32>
    %35 = vector.shape_cast %26 : vector<64x64xf32> to vector<8x8x64xf32>
    %36 = vector.broadcast %32 : vector<8x8x1xf32> to vector<8x8x64xf32>
    %37 = arith.mulf %36, %35 : vector<8x8x64xf32>
    %cst_19 = arith.constant dense<0xFF800000> : vector<8x64xf32>
    %38 = vector.multi_reduction <maximumf>, %37, %cst_19 [1] : vector<8x8x64xf32> to vector<8x64xf32>
    %cst_20 = arith.constant 8.000000e+00 : f32
    %39 = vector.broadcast %cst_20 : f32 to vector<8x1xf32>
    %40 = arith.mulf %34, %39 : vector<8x1xf32>
    %41 = vector.broadcast %40 : vector<8x1xf32> to vector<8x64xf32>
    %42 = arith.mulf %38, %41 : vector<8x64xf32>
    %43 = arith.truncf %42 : vector<8x64xf32> to vector<8x64xbf16>
    %c0_21 = arith.constant 0 : index
    %c0_22 = arith.constant 0 : index
    %44 = vector.load %arg5[%c0_21, %c0_22] : memref<64x16xbf16, #tpu.memory_space<vmem>>, vector<64x16xbf16>
    %cst_23 = arith.constant dense<0.000000e+00> : vector<8x16xf32>
    %45 = tpu.matmul %43, %44, %cst_23 {dimension_numbers = #tpu.dot_dimension_numbers<[1], [0], [0], [1], [0, 0, 1, 1], [], []>} : vector<8x64xbf16>, vector<64x16xbf16>, vector<8x16xf32> -> vector<8x16xf32>
    %c3 = arith.constant 3 : index
    %c0_24 = arith.constant 0 : index
    %46 = vector.load %arg7[%c3, %c0_24] : memref<8x128xf32, #tpu.memory_space<vmem>>, vector<1x16xf32>
    %47 = vector.broadcast %46 : vector<1x16xf32> to vector<8x16xf32>
    %48 = arith.addf %45, %47 : vector<8x16xf32>
    %cst_25 = arith.constant 0.000000e+00 : f32
    %49 = vector.broadcast %cst_25 : f32 to vector<8x16xf32>
    %50 = arith.maximumf %48, %49 : vector<8x16xf32>
    %51 = arith.truncf %50 : vector<8x16xf32> to vector<8x16xbf16>
    %c0_26 = arith.constant 0 : index
    %c0_27 = arith.constant 0 : index
    %52 = vector.load %arg6[%c0_26, %c0_27] : memref<16x1xbf16, #tpu.memory_space<vmem>>, vector<16x1xbf16>
    %cst_28 = arith.constant dense<0.000000e+00> : vector<8x1xf32>
    %53 = tpu.matmul %51, %52, %cst_28 {dimension_numbers = #tpu.dot_dimension_numbers<[1], [0], [0], [1], [0, 0, 1, 1], [], []>} : vector<8x16xbf16>, vector<16x1xbf16>, vector<8x1xf32> -> vector<8x1xf32>
    %c4 = arith.constant 4 : index
    %c0_29 = arith.constant 0 : index
    %54 = vector.load %arg7[%c4, %c0_29] : memref<8x128xf32, #tpu.memory_space<vmem>>, vector<1x1xf32>
    %55 = vector.broadcast %54 : vector<1x1xf32> to vector<8x1xf32>
    %56 = arith.addf %53, %55 : vector<8x1xf32>
    %c0_30 = arith.constant 0 : index
    %c0_31 = arith.constant 0 : index
    %57 = vector.load %arg8[%c0_30, %c0_31] : memref<8x1xf32, #tpu.memory_space<vmem>>, vector<8x1xf32>
    tpu.vector_store %arg8[%c0_30, %c0_31], %56 {strides = array<i32>} : memref<8x1xf32, #tpu.memory_space<vmem>>, vector<8x1xf32>,
    return
  }
  func.func @transform_0(%arg0: i32) -> (i32, i32, i32) {
    %c0_i32 = arith.constant 0 : i32
    %c0_i32_0 = arith.constant 0 : i32
    %c0_i32_1 = arith.constant 0 : i32
    return %arg0, %c0_i32, %c0_i32_0 : i32, i32, i32
  }
  func.func @transform_1(%arg0: i32) -> (i32, i32) {
    %c0_i32 = arith.constant 0 : i32
    %c0_i32_0 = arith.constant 0 : i32
    %c0_i32_1 = arith.constant 0 : i32
    return %c0_i32, %c0_i32_0 : i32, i32
  }
  func.func @transform_2(%arg0: i32) -> (i32, i32) {
    %c0_i32 = arith.constant 0 : i32
    %c0_i32_0 = arith.constant 0 : i32
    %c0_i32_1 = arith.constant 0 : i32
    return %c0_i32, %c0_i32_0 : i32, i32
  }
  func.func @transform_3(%arg0: i32) -> (i32, i32) {
    %c0_i32 = arith.constant 0 : i32
    %c0_i32_0 = arith.constant 0 : i32
    %c0_i32_1 = arith.constant 0 : i32
    return %c0_i32, %c0_i32_0 : i32, i32
  }
  func.func @transform_4(%arg0: i32) -> (i32, i32) {
    %c0_i32 = arith.constant 0 : i32
    %c0_i32_0 = arith.constant 0 : i32
    %c0_i32_1 = arith.constant 0 : i32
    return %c0_i32, %c0_i32_0 : i32, i32
  }
  func.func @transform_5(%arg0: i32) -> (i32, i32) {
    %c0_i32 = arith.constant 0 : i32
    %c0_i32_0 = arith.constant 0 : i32
    %c0_i32_1 = arith.constant 0 : i32
    return %c0_i32, %c0_i32_0 : i32, i32
  }
  func.func @transform_6(%arg0: i32) -> (i32, i32) {
    %c0_i32 = arith.constant 0 : i32
    %c0_i32_0 = arith.constant 0 : i32
    %c0_i32_1 = arith.constant 0 : i32
    return %c0_i32, %c0_i32_0 : i32, i32
  }
  func.func @transform_7(%arg0: i32) -> (i32, i32) {
    %c0_i32 = arith.constant 0 : i32
    %c0_i32_0 = arith.constant 0 : i32
    return %arg0, %c0_i32 : i32, i32
  }
}

</mosaic_0001>

<bundles_post_ra>
// kernel: tpu_custom_call.1
= control target key start
LH: loop header
LB: loop body
LE: loop exit
PB: predicated region body
PF: predicated region fallthrough
CT: control target
= control target key end

     0   :  { %12 = vsyncpa [#allocation3], 0  ;;  %s1171_s0 = inlined_call_operand.vmem [shape: bf16[8,8,36], index: 0, kind: input, shape index: {}]   ;;  %s1172_s1 = inlined_call_operand.hbm [shape: bf16[36,65], index: 1, kind: input, shape index: {}]   ;;  %s1173_s2 = inlined_call_operand.hbm [shape: bf16[64,64], index: 2, kind: input, shape index: {}]   ;;  %s1174_s3 = inlined_call_operand.hbm [shape: bf16[64,64], index: 3, kind: input, shape index: {}]   ;;  %s1175_s4 = inlined_call_operand.vmem [shape: bf16[64,16], index: 4, kind: input, shape index: {}]   ;;  %s1176_s5 = inlined_call_operand.vmem [shape: bf16[16,1], index: 5, kind: input, shape index: {}]   ;;  %s1177_s6 = inlined_call_operand.vmem [shape: f32[8,128], index: 6, kind: input, shape index: {}]   ;;  %s1178_s7 = inlined_call_operand.vmem [shape: f32[8,1], index: 7, kind: output, shape index: {}]  }
   0x1   :  { %13 = vsyncpa [#allocation5], 0  ;;  %s33_s26 = sshll.u32 %s1173_s2, 4  ;;  %s1015_s27 = smov [#allocation4]   ;;  %s34_s26 = int_to_ptr.hbm [resolvable:$true] %s33_s26 }
   0x2   :  { %s35_s28 = sshll.u32 %s1015_s27, 4  ;;  %s20_s8 = sshll.u32 %s1172_s1, 4  ;;  %s36_s28 = int_to_ptr.vmem [resolvable:$true] %s35_s28  ;;  %s21_s8 = int_to_ptr.hbm [resolvable:$true] %s20_s8 }
   0x3   :  { %s1016_s9 = smov 64   ;;  %s1017_s10 = smov 4  }
   0x4   :  { %41 = dma.hbm_to_vmem [thread:$0]  %s34_s26, 512, %s36_s28, [#allocation5], %s1016_s9, %s1016_s9, %s1017_s10  }
   0x5   :  { %s1018_s11 = smov [#allocation2]   ;;  %s46_s15 = sshll.u32 %s1174_s3, 4  ;;  %s47_s15 = int_to_ptr.hbm [resolvable:$true] %s46_s15 }
   0x6   :  { %s22_s12 = sshll.u32 %s1018_s11, 4  ;;  %s1019_s2 = smov [#allocation6]   ;;  %s23_s12 = int_to_ptr.vmem [resolvable:$true] %s22_s12 }
   0x7   :  { %28 = dma.hbm_to_vmem [thread:$0]  %s21_s8, 320, %s23_s12, [#allocation3], %s1016_s9, %s1016_s9, %s1017_s10  }
   0x8   :  { %s48_s16 = sshll.u32 %s1019_s2, 4  ;;  %s49_s16 = int_to_ptr.vmem [resolvable:$true] %s48_s16 }
   0x9   :  { %54 = dma.hbm_to_vmem [thread:$0]  %s47_s15, 512, %s49_s16, [#allocation5], %s1016_s9, %s1016_s9, %s1017_s10  }
   0xa   :  { %1011 = dma.done.wait [#allocation3], 320  }
   0xb   :  { %1012 = vsyncadd [#allocation3], 4294966976 }
   0xc   :  { %1013 = dma.done.wait [#allocation5], 1024  }
   0xd   :  { %1014 = vsyncadd [#allocation5], 4294966272  ;;  %v86_v0 = vld [vmem:[#allocation2 + $0x10] sm:$0x3]  ;;  %vm137_vm0 = vcmask 1041408   ;;  %v879_v4 = vld [vmem:[#allocation2 + $0x8] sm:$0xff] }
   0xe   :  { %v118_v1 = vunpack.c.l.b16 %v86_v0  ;;  %v878_v5 = vld [vmem:[#allocation2] sm:$0xff]  ;;  %vm124_vm1 = vcmask 293888   ;;  %v875_v7 = vld [vmem:[%s1171_s0 + $0x8] sm:$0xff]  ;;  %v876_v8 = vld [vmem:[%s1171_s0 + $0x10] sm:$0xff]  ;;  %v1020_v14 = vmov 64   ;;  %vm353_vm2 = vcmask 531968  }
   0xf   :  { %v874_v6 = vld [vmem:[%s1171_s0] sm:$0xff]  ;;  %v877_v9 = vld [vmem:[%s1171_s0 + $0x18] sm:$0xff]  ;;  %v883_v10 = vld [vmem:[#allocation4 + $0x18] sm:$0xff]  ;;  %899 = vset.pattern.permute.xlu0 %v1020_v14  ;;  %900 = vset.pattern.permute.xlu1 %v1020_v14  ;;  %vm216_vm3 = vcmask 523264   ;;  %vm692_vm4 = vcmask 1041409   ;;  %vm694_vm5 = vcmask 1042434  }
  0x10   :  { %v121_v2 = vpack.c.b16 %v118_v1, %v118_v1  ;;  %233 = vmatpush.bf16.msra.mxu1 %v883_v10  ;;  %v882_v11 = vld [vmem:[#allocation4 + $0x10] sm:$0xff]  ;;  %v881_v12 = vld [vmem:[#allocation4 + $0x8] sm:$0xff]  ;;  %v880_v13 = vld [vmem:[#allocation4] sm:$0xff]  ;;  %901 = vset.pattern.permute.xlu2 %v1020_v14  ;;  %vm696_vm6 = vcmask 1043459   ;;  %vm698_vm7 = vcmask 1044484   ;;  %vm700_vm8 = vcmask 1045509  }
  0x11   :  { %v1085_v15 = vld [vmem:[%s1177_s6] ss:$0 sm:$0xff]  ;;  %vm702_vm9 = vcmask 1046534   ;;  %vm704_vm10 = vcmask 1047559   ;;  %vm759_vm11 = vcmask 130048   ;;  %vm776_vm12 = vcmask 7168  }
  0x12   :  { %v139_v3 = vsel %vm137_vm0, %v121_v2, 0 }
  0x13   :  { %146 = vmatpush.bf16.msra.mxu0 %v139_v3 }
  0x14   :  { %234 = vmatpush.bf16.msra.mxu1 %v882_v11 }
  0x17   :  { %147 = vmatpush.bf16.msra.mxu0 %v879_v4 }
  0x18   :  { %235 = vmatpush.bf16.msra.mxu1 %v881_v12 }
  0x1b   :  { %148 = vmatpush.bf16.msra.mxu0 %v878_v5 }
  0x1c   :  { %236 = vmatpush.bf16.msra.mxu1 %v880_v13 }
  0x1e   :  { %808 = vmatmul.msk.bf16.vlgmr.msra.gmra.mxu0 %vm124_vm1, %v874_v6 }
  0x2e   :  { %809 = vmatmul.msk.bf16.gmra.mxu0 %vm124_vm1, %v875_v7 }
  0x3e   :  { %810 = vmatmul.msk.bf16.gmra.mxu0 %vm124_vm1, %v876_v8 }
  0x4e   :  { %811 = vmatmul.msk.bf16.gmra.mxu0 %vm124_vm1, %v877_v9 }
  0x9b   :  { %v150_v16 = vpop.f32.mrf.mxu0 }
  0x9c   :  { %v151_v17 = vadd.f32 %v1085_v15, %v150_v16 }
  0x9e   :  { %v354_v18 = vsel %vm353_vm2, %v151_v17, -inf  ;;  %v170_v25 = vmax.f32 %v151_v17, 0.0 }
  0x9f   :  { %v355_v19 = vrot.slane %v354_v18, 4 }
  0xa1   :  { %v356_v20 = vmax.f32 %v354_v18, %v355_v19 }
  0xa3   :  { %v357_v21 = vrot.slane %v356_v20, 2  ;;  %v152_v22 = vpop.f32.mrf.mxu0 }
  0xa4   :  { %v153_v23 = vadd.f32 %v1085_v15, %v152_v22 }
  0xa5   :  { %v358_v24 = vmax.f32 %v356_v20, %v357_v21 }
  0xa6   :  { %v171_v26 = vmax.f32 %v153_v23, 0.0  ;;  %v361_v27 = vsel %vm353_vm2, %v153_v23, -inf }
  0xa7   :  { %v359_v28 = vrot.slane %v358_v24, 1  ;;  %v362_v29 = vrot.slane %v361_v27, 4 }
  0xa8   :  { %v178_v30 = vpack.c.bf16 %v171_v26, %v170_v25 }
  0xa9   :  { %v360_v31 = vmax.f32 %v358_v24, %v359_v28  ;;  %v363_v32 = vmax.f32 %v361_v27, %v362_v29 }
  0xaa   :  { %828 = vmatmul.msk.bf16.vlgmr.msra.gmra.mxu1 %vm216_vm3, %v178_v30 }
  0xab   :  { %v410_v33 = vsub.f32 %v151_v17, %v360_v31  ;;  %v364_v34 = vrot.slane %v363_v32, 2  ;;  %v155_v35 = vpop.f32.mrf.mxu0 }
  0xac   :  { %v156_v36 = vadd.f32 %v1085_v15, %v155_v35 }
  0xad   :  { %v418_v37 = vmul.f32 1.442695, %v410_v33  ;;  %v365_v38 = vmax.f32 %v363_v32, %v364_v34 }
  0xae   :  { %v368_v39 = vsel %vm353_vm2, %v156_v36, -inf  ;;  %v172_v51 = vmax.f32 %v156_v36, 0.0 }
  0xaf   :  { %907 = vpow2.f32 %v418_v37  ;;  %v366_v40 = vrot.slane %v365_v38, 1  ;;  %v369_v41 = vrot.slane %v368_v39, 4 }
  0xb1   :  { %v367_v42 = vmax.f32 %v365_v38, %v366_v40  ;;  %v370_v43 = vmax.f32 %v368_v39, %v369_v41 }
  0xb3   :  { %v411_v44 = vsub.f32 %v153_v23, %v367_v42  ;;  %v371_v45 = vrot.slane %v370_v43, 2  ;;  %v157_v46 = vpop.f32.mrf.mxu0 }
  0xb4   :  { %v158_v47 = vadd.f32 %v1085_v15, %v157_v46 }
  0xb5   :  { %v908_v48 = vpop.eup %907  ;;  %v420_v49 = vmul.f32 1.442695, %v411_v44  ;;  %v372_v50 = vmax.f32 %v370_v43, %v371_v45 }
  0xb6   :  { %v173_v52 = vmax.f32 %v158_v47, 0.0  ;;  %v375_v53 = vsel %vm353_vm2, %v158_v47, -inf  ;;  %500 = vperm.xlu0 %899, %v908_v48   ;;  %v434_v54 = vsel %vm353_vm2, %v908_v48, 0.0 }
  0xb7   :  { %909 = vpow2.f32 %v420_v49  ;;  %v373_v55 = vrot.slane %v372_v50, 1  ;;  %v376_v56 = vrot.slane %v375_v53, 4  ;;  %v435_v57 = vrot.slane %v434_v54, 4 }
  0xb8   :  { %v179_v58 = vpack.c.bf16 %v173_v52, %v172_v51 }
  0xb9   :  { %v374_v59 = vmax.f32 %v372_v50, %v373_v55  ;;  %v377_v60 = vmax.f32 %v375_v53, %v376_v56  ;;  %v436_v61 = vadd.f32 %v435_v57, %v434_v54 }
  0xba   :  { %829 = vmatmul.msk.bf16.gmra.mxu1 %vm216_vm3, %v179_v58 }
  0xbb   :  { %v412_v62 = vsub.f32 %v156_v36, %v374_v59  ;;  %v378_v63 = vrot.slane %v377_v60, 2  ;;  %v160_v0 = vpop.f32.mrf.mxu0  ;;  %v437_v1 = vrot.slane %v436_v61, 2 }
  0xbc   :  { %v161_v2 = vadd.f32 %v1085_v15, %v160_v0 }
  0xbd   :  { %v910_v3 = vpop.eup %909  ;;  %v422_v4 = vmul.f32 1.442695, %v412_v62  ;;  %v379_v5 = vmax.f32 %v377_v60, %v378_v63  ;;  %v438_v6 = vadd.f32 %v437_v1, %v436_v61 }
  0xbe   :  { %v382_v7 = vsel %vm353_vm2, %v161_v2, -inf  ;;  %505 = vperm.xlu0 %899, %v910_v3   ;;  %v441_v8 = vsel %vm353_vm2, %v910_v3, 0.0  ;;  %v174_v26 = vmax.f32 %v161_v2, 0.0 }
  0xbf   :  { %911 = vpow2.f32 %v422_v4  ;;  %v380_v9 = vrot.slane %v379_v5, 1  ;;  %v383_v10 = vrot.slane %v382_v7, 4  ;;  %v439_v11 = vrot.slane %v438_v6, 1 }
  0xc0   :  { %v442_v12 = vrot.slane %v441_v8, 4 }
  0xc1   :  { %v381_v13 = vmax.f32 %v379_v5, %v380_v9  ;;  %v384_v14 = vmax.f32 %v382_v7, %v383_v10  ;;  %v440_v16 = vadd.f32 %v439_v11, %v438_v6 }
  0xc2   :  { %v443_v17 = vadd.f32 %v442_v12, %v441_v8 }
  0xc3   :  { %v413_v18 = vsub.f32 %v158_v47, %v381_v13  ;;  %v385_v19 = vrot.slane %v384_v14, 2  ;;  %v162_v20 = vpop.f32.mrf.mxu0  ;;  %913 = vrcp.f32 %v440_v16 }
  0xc4   :  { %v163_v21 = vadd.f32 %v1085_v15, %v162_v20  ;;  %v444_v22 = vrot.slane %v443_v17, 2 }
  0xc5   :  { %v912_v23 = vpop.eup %911  ;;  %v424_v24 = vmul.f32 1.442695, %v413_v18  ;;  %v386_v25 = vmax.f32 %v384_v14, %v385_v19 }
  0xc6   :  { %v175_v27 = vmax.f32 %v163_v21, 0.0  ;;  %v389_v28 = vsel %vm353_vm2, %v163_v21, -inf  ;;  %510 = vperm.xlu1 %900, %v912_v23   ;;  %v445_v29 = vadd.f32 %v444_v22, %v443_v17  ;;  %v448_v48 = vsel %vm353_vm2, %v912_v23, 0.0 }
  0xc7   :  { %915 = vpow2.f32 %v424_v24  ;;  %v387_v30 = vrot.slane %v386_v25, 1  ;;  %v390_v31 = vrot.slane %v389_v28, 4  ;;  %v449_v55 = vrot.slane %v448_v48, 4 }
  0xc8   :  { %v180_v32 = vpack.c.bf16 %v175_v27, %v174_v26  ;;  %v446_v33 = vrot.slane %v445_v29, 1 }
  0xc9   :  { %v914_v34 = vpop.eup %913  ;;  %v388_v35 = vmax.f32 %v386_v25, %v387_v30  ;;  %v391_v36 = vmax.f32 %v389_v28, %v390_v31  ;;  %v450_v3 = vadd.f32 %v449_v55, %v448_v48 }
  0xca   :  { %830 = vmatmul.msk.bf16.gmra.mxu1 %vm216_vm3, %v180_v32  ;;  %v602_v37 = vmul.f32 8.0, %v914_v34  ;;  %v447_v38 = vadd.f32 %v446_v33, %v445_v29 }
  0xcb   :  { %v414_v39 = vsub.f32 %v161_v2, %v388_v35  ;;  %v392_v40 = vrot.slane %v391_v36, 2  ;;  %v165_v41 = vpop.f32.mrf.mxu0  ;;  %v451_v19 = vrot.slane %v450_v3, 2 }
  0xcc   :  { %v166_v42 = vadd.f32 %v1085_v15, %v165_v41  ;;  %612 = vperm.xlu2 %901, %v602_v37   ;;  %917 = vrcp.f32 %v447_v38 }
  0xcd   :  { %v916_v43 = vpop.eup %915  ;;  %v426_v44 = vmul.f32 1.442695, %v414_v39  ;;  %v393_v45 = vmax.f32 %v391_v36, %v392_v40  ;;  %v452_v27 = vadd.f32 %v451_v19, %v450_v3 }
  0xce   :  { %v396_v46 = vsel %vm353_vm2, %v166_v42, -inf  ;;  %515 = vperm.xlu1 %900, %v916_v43   ;;  %v455_v47 = vsel %vm353_vm2, %v916_v43, 0.0  ;;  %v176_v4 = vmax.f32 %v166_v42, 0.0 }
  0xcf   :  { %919 = vpow2.f32 %v426_v44  ;;  %v394_v49 = vrot.slane %v393_v45, 1  ;;  %v397_v50 = vrot.slane %v396_v46, 4  ;;  %v456_v51 = vrot.slane %v455_v47, 4 }
  0xd0   :  { %v453_v35 = vrot.slane %v452_v27, 1 }
  0xd1   :  { %v395_v52 = vmax.f32 %v393_v45, %v394_v49  ;;  %v398_v53 = vmax.f32 %v396_v46, %v397_v50  ;;  %v457_v54 = vadd.f32 %v456_v51, %v455_v47 }
  0xd2   :  { %v918_v56 = vpop.eup %917 }
  0xd3   :  { %v415_v57 = vsub.f32 %v163_v21, %v395_v52  ;;  %v399_v58 = vrot.slane %v398_v53, 2  ;;  %v167_v59 = vpop.f32.mrf.mxu0  ;;  %v603_v60 = vmul.f32 8.0, %v918_v56  ;;  %v458_v61 = vrot.slane %v457_v54, 2 }
  0xd4   :  { %v168_v62 = vadd.f32 %v1085_v15, %v167_v59 }
  0xd5   :  { %v920_v63 = vpop.eup %919  ;;  %v428_v0 = vmul.f32 1.442695, %v415_v57  ;;  %v400_v1 = vmax.f32 %v398_v53, %v399_v58  ;;  %617 = vperm.xlu0 %899, %v603_v60   ;;  %v459_v2 = vadd.f32 %v458_v61, %v457_v54 }
  0xd6   :  { %v177_v5 = vmax.f32 %v168_v62, 0.0  ;;  %v403_v6 = vsel %vm353_vm2, %v168_v62, -inf  ;;  %520 = vperm.xlu2 %901, %v920_v63   ;;  %v462_v7 = vsel %vm353_vm2, %v920_v63, 0.0 }
  0xd7   :  { %921 = vpow2.f32 %v428_v0  ;;  %v401_v8 = vrot.slane %v400_v1, 1  ;;  %v404_v9 = vrot.slane %v403_v6, 4  ;;  %v460_v10 = vrot.slane %v459_v2, 1 }
  0xd8   :  { %v181_v11 = vpack.c.bf16 %v177_v5, %v176_v4  ;;  %v463_v12 = vrot.slane %v462_v7, 4  ;;  %v887_v5 = vld [vmem:[#allocation6 + $0x18] sm:$0xff] }
  0xd9   :  { %v402_v15 = vmax.f32 %v400_v1, %v401_v8  ;;  %v405_v13 = vmax.f32 %v403_v6, %v404_v9  ;;  %v461_v14 = vadd.f32 %v460_v10, %v459_v2  ;;  %320 = vmatpush.bf16.msra.mxu2 %v887_v5  ;;  %v886_v6 = vld [vmem:[#allocation6 + $0x10] sm:$0xff]  ;;  %v884_v8 = vld [vmem:[#allocation6] sm:$0xff]  ;;  %v903_v10 = vld [vmem:[%s1177_s6 + $0x1] ss:$0 sm:$0xff] }
  0xda   :  { %831 = vmatmul.msk.bf16.gmra.mxu1 %vm216_vm3, %v181_v11  ;;  %v464_v16 = vadd.f32 %v463_v12, %v462_v7  ;;  %v885_v7 = vld [vmem:[#allocation6 + $0x8] sm:$0xff] }
  0xdb   :  { %v416_v17 = vsub.f32 %v166_v42, %v402_v15  ;;  %v406_v18 = vrot.slane %v405_v13, 2  ;;  %923 = vrcp.f32 %v461_v14  ;;  %v454_v42 = vadd.f32 %v453_v35, %v452_v27 }
  0xdc   :  { %v465_v20 = vrot.slane %v464_v16, 2 }
  0xdd   :  { %v922_v21 = vpop.eup %921  ;;  %v430_v22 = vmul.f32 1.442695, %v416_v17  ;;  %v407_v23 = vmax.f32 %v405_v13, %v406_v18  ;;  %321 = vmatpush.bf16.msra.mxu2 %v886_v6 }
  0xde   :  { %525 = vperm.xlu2 %901, %v922_v21   ;;  %v466_v24 = vadd.f32 %v465_v20, %v464_v16  ;;  %v469_v25 = vsel %vm353_vm2, %v922_v21, 0.0 }
  0xdf   :  { %925 = vpow2.f32 %v430_v22  ;;  %v408_v26 = vrot.slane %v407_v23, 1  ;;  %v470_v28 = vrot.slane %v469_v25, 4 }
  0xe0   :  { %v467_v29 = vrot.slane %v466_v24, 1 }
  0xe1   :  { %v924_v30 = vpop.eup %923  ;;  %v409_v31 = vmax.f32 %v407_v23, %v408_v26  ;;  %v471_v32 = vadd.f32 %v470_v28, %v469_v25  ;;  %322 = vmatpush.bf16.msra.mxu2 %v885_v7 }
  0xe2   :  { %v468_v33 = vadd.f32 %v467_v29, %v466_v24  ;;  %v605_v37 = vmul.f32 8.0, %v924_v30 }
  0xe3   :  { %v417_v34 = vsub.f32 %v168_v62, %v409_v31  ;;  %v472_v36 = vrot.slane %v471_v32, 2 }
  0xe4   :  { %927 = vrcp.f32 %v468_v33 }
  0xe5   :  { %v926_v38 = vpop.eup %925  ;;  %v432_v39 = vmul.f32 1.442695, %v417_v34  ;;  %v473_v41 = vadd.f32 %v472_v36, %v471_v32  ;;  %323 = vmatpush.bf16.msra.mxu2 %v884_v8 }
  0xe6   :  { %530 = vperm.xlu0 %899, %v926_v38   ;;  %627 = vperm.xlu2 %901, %v605_v37   ;;  %v476_v40 = vsel %vm353_vm2, %v926_v38, 0.0 }
  0xe7   :  { %929 = vpow2.f32 %v432_v39  ;;  %v477_v43 = vrot.slane %v476_v40, 4  ;;  %v474_v46 = vrot.slane %v473_v41, 1 }
  0xe8   :  { %931 = vrcp.f32 %v454_v42  ;;  %v1125_v42 = vld [vmem:[%s1177_s6 + $0x2] ss:$0 sm:$0xff] }
  0xe9   :  { %v478_v44 = vadd.f32 %v477_v43, %v476_v40  ;;  %v475_v51 = vadd.f32 %v474_v46, %v473_v41 }
  0xea   :  { %v928_v45 = vpop.eup %927 }
  0xeb   :  { %v479_v47 = vrot.slane %v478_v44, 2  ;;  %v606_v48 = vmul.f32 8.0, %v928_v45  ;;  %933 = vrcp.f32 %v475_v51 }
  0xed   :  { %v930_v49 = vpop.eup %929  ;;  %v480_v50 = vadd.f32 %v479_v47, %v478_v44 }
  0xee   :  { %535 = vperm.xlu1 %900, %v930_v49   ;;  %632 = vperm.xlu0 %899, %v606_v48   ;;  %v483_v52 = vsel %vm353_vm2, %v930_v49, 0.0  ;;  %v932_v55 = vpop.eup %931 }
  0xef   :  { %v481_v53 = vrot.slane %v480_v50, 1  ;;  %v484_v54 = vrot.slane %v483_v52, 4  ;;  %v604_v59 = vmul.f32 8.0, %v932_v55 }
  0xf1   :  { %v482_v56 = vadd.f32 %v481_v53, %v480_v50  ;;  %v485_v57 = vadd.f32 %v484_v54, %v483_v52  ;;  %v934_v62 = vpop.eup %933 }
  0xf2   :  { %v607_v2 = vmul.f32 8.0, %v934_v62 }
  0xf3   :  { %935 = vrcp.f32 %v482_v56  ;;  %v486_v58 = vrot.slane %v485_v57, 2 }
  0xf5   :  { %v487_v60 = vadd.f32 %v486_v58, %v485_v57 }
  0xf6   :  { %622 = vperm.xlu1 %900, %v604_v59  }
  0xf7   :  { %v488_v61 = vrot.slane %v487_v60, 1 }
  0xf9   :  { %v936_v63 = vpop.eup %935  ;;  %v489_v0 = vadd.f32 %v488_v61, %v487_v60 }
  0xfa   :  { %v608_v1 = vmul.f32 8.0, %v936_v63 }
  0xfb   :  { %937 = vrcp.f32 %v489_v0 }
  0xfc   :  { %642 = vperm.xlu2 %901, %v608_v1  }
  0xfe   :  { %637 = vperm.xlu1 %900, %v607_v2   ;;  %v891_v2 = vld [vmem:[%s1175_s4 + $0x18] sm:$0xff] }
  0xff   :  { %738 = vmatpush.bf16.msra.mxu3 %v891_v2 }
 0x101   :  { %v938_v3 = vpop.eup %937 }
 0x102   :  { %v609_v4 = vmul.f32 8.0, %v938_v3 }
 0x104   :  { %647 = vperm.xlu0 %899, %v609_v4  }
 0x126   :  { %v1128_v46 = vpop.permute.xlu2 %612 }
 0x127   :  { %v238_v9 = vpop.f32.mrf.mxu1 }
 0x128   :  { %v239_v11 = vadd.f32 %v903_v10, %v238_v9  ;;  %v501_v41 = vpop.permute.xlu0 %500 }
 0x12a   :  { %v258_v13 = vmax.f32 %v239_v11, 0.0  ;;  %v890_v11 = vld [vmem:[%s1175_s4 + $0x10] sm:$0xff] }
 0x12b   :  { %739 = vmatpush.bf16.msra.mxu3 %v890_v11 }
 0x12f   :  { %v240_v12 = vpop.f32.mrf.mxu1 }
 0x130   :  { %v241_v15 = vadd.f32 %v903_v10, %v240_v12  ;;  %v506_v54 = vpop.permute.xlu0 %505  ;;  %v521_v58 = vpop.permute.xlu2 %520 }
 0x132   :  { %v259_v14 = vmax.f32 %v241_v15, 0.0 }
 0x134   :  { %v266_v16 = vpack.c.bf16 %v259_v14, %v258_v13 }
 0x136   :  { %848 = vmatmul.msk.bf16.vlgmr.msra.gmra.mxu2 %vm216_vm3, %v266_v16  ;;  %v889_v16 = vld [vmem:[%s1175_s4 + $0x8] sm:$0xff] }
 0x137   :  { %v243_v17 = vpop.f32.mrf.mxu1  ;;  %740 = vmatpush.bf16.msra.mxu3 %v889_v16 }
 0x138   :  { %v244_v18 = vadd.f32 %v903_v10, %v243_v17  ;;  %v511_v43 = vpop.permute.xlu1 %510  ;;  %v526_v17 = vpop.permute.xlu2 %525 }
 0x13a   :  { %v260_v21 = vmax.f32 %v244_v18, 0.0 }
 0x13f   :  { %v245_v19 = vpop.f32.mrf.mxu1 }
 0x140   :  { %v246_v20 = vadd.f32 %v903_v10, %v245_v19  ;;  %v516_v59 = vpop.permute.xlu1 %515 }
 0x142   :  { %v261_v22 = vmax.f32 %v246_v20, 0.0 }
 0x144   :  { %v267_v23 = vpack.c.bf16 %v261_v22, %v260_v21 }
 0x146   :  { %849 = vmatmul.msk.bf16.gmra.mxu2 %vm216_vm3, %v267_v23 }
 0x147   :  { %v248_v24 = vpop.f32.mrf.mxu1  ;;  %v618_v18 = vpop.permute.xlu0 %617 }
 0x148   :  { %v249_v25 = vadd.f32 %v903_v10, %v248_v24 }
 0x14a   :  { %v262_v28 = vmax.f32 %v249_v25, 0.0 }
 0x14f   :  { %v250_v26 = vpop.f32.mrf.mxu1 }
 0x150   :  { %v251_v27 = vadd.f32 %v903_v10, %v250_v26 }
 0x152   :  { %v263_v29 = vmax.f32 %v251_v27, 0.0  ;;  %v888_v27 = vld [vmem:[%s1175_s4] sm:$0xff] }
 0x153   :  { %741 = vmatpush.bf16.msra.mxu3 %v888_v27 }
 0x154   :  { %v268_v30 = vpack.c.bf16 %v263_v29, %v262_v28 }
 0x156   :  { %850 = vmatmul.msk.bf16.gmra.mxu2 %vm216_vm3, %v268_v30 }
 0x157   :  { %v253_v31 = vpop.f32.mrf.mxu1 }
 0x158   :  { %v254_v32 = vadd.f32 %v903_v10, %v253_v31 }
 0x15a   :  { %v264_v35 = vmax.f32 %v254_v32, 0.0 }
 0x15f   :  { %v255_v33 = vpop.f32.mrf.mxu1 }
 0x160   :  { %v256_v34 = vadd.f32 %v903_v10, %v255_v33  ;;  %v536_v24 = vpop.permute.xlu1 %535 }
 0x162   :  { %v265_v36 = vmax.f32 %v256_v34, 0.0 }
 0x164   :  { %v269_v37 = vpack.c.bf16 %v265_v36, %v264_v35 }
 0x166   :  { %851 = vmatmul.msk.bf16.gmra.mxu2 %vm216_vm3, %v269_v37 }
 0x1b9   :  { %v325_v38 = vpop.f32.mrf.mxu2 }
 0x1ba   :  { %v326_v48 = vadd.f32 %v1125_v42, %v325_v38  ;;  %v531_v38 = vpop.permute.xlu0 %530 }
 0x1bc   :  { %v345_v52 = vmax.f32 %v326_v48, 0.0 }
 0x1be   :  { %v538_v61 = vmul.f32 %v501_v41, %v345_v52 }
 0x1c0   :  { %v546_v4 = vsel %vm216_vm3, %v538_v61, -inf }
 0x1c1   :  { %v327_v39 = vpop.f32.mrf.mxu2  ;;  %v547_v12 = vrot.slane %v546_v4, 4 }
 0x1c2   :  { %v328_v45 = vadd.f32 %v1125_v42, %v327_v39 }
 0x1c3   :  { %v548_v22 = vmax.f32 %v546_v4, %v547_v12 }
 0x1c4   :  { %v346_v50 = vmax.f32 %v328_v45, 0.0 }
 0x1c5   :  { %v549_v33 = vrot.slane %v548_v22, 2 }
 0x1c6   :  { %v539_v56 = vmul.f32 %v506_v54, %v346_v50  ;;  %v623_v54 = vpop.permute.xlu1 %622 }
 0x1c7   :  { %v550_v45 = vmax.f32 %v548_v22, %v549_v33 }
 0x1c8   :  { %v553_v0 = vsel %vm216_vm3, %v539_v56, -inf }
 0x1c9   :  { %v330_v40 = vpop.f32.mrf.mxu2  ;;  %v554_v6 = vrot.slane %v553_v0, 4 }
 0x1ca   :  { %v331_v47 = vadd.f32 %v1125_v42, %v330_v40 }
 0x1cb   :  { %v555_v19 = vmax.f32 %v553_v0, %v554_v6 }
 0x1cc   :  { %v347_v51 = vmax.f32 %v331_v47, 0.0 }
 0x1cd   :  { %v556_v28 = vrot.slane %v555_v19, 2 }
 0x1ce   :  { %v540_v60 = vmul.f32 %v511_v43, %v347_v51 }
 0x1cf   :  { %v557_v39 = vmax.f32 %v555_v19, %v556_v28  ;;  %v638_v19 = vpop.permute.xlu1 %637 }
 0x1d0   :  { %v560_v3 = vsel %vm216_vm3, %v540_v60, -inf }
 0x1d1   :  { %v332_v44 = vpop.f32.mrf.mxu2  ;;  %v561_v9 = vrot.slane %v560_v3, 4  ;;  %v558_v50 = vrot.slane %v557_v39, 1 }
 0x1d2   :  { %v333_v49 = vadd.f32 %v1125_v42, %v332_v44  ;;  %v892_v44 = vld [vmem:[%s1176_s5] sm:$0xff] }
 0x1d3   :  { %v562_v20 = vmax.f32 %v560_v3, %v561_v9  ;;  %770 = vmatpush.bf16.msrb.mxu3 %v892_v44 }
 0x1d4   :  { %v348_v53 = vmax.f32 %v333_v49, 0.0 }
 0x1d5   :  { %v563_v31 = vrot.slane %v562_v20, 2 }
 0x1d6   :  { %v541_v62 = vmul.f32 %v516_v59, %v348_v53 }
 0x1d7   :  { %v564_v41 = vmax.f32 %v562_v20, %v563_v31 }
 0x1d8   :  { %v567_v5 = vsel %vm216_vm3, %v541_v62, -inf  ;;  %v628_v62 = vpop.permute.xlu2 %627 }
 0x1d9   :  { %v335_v55 = vpop.f32.mrf.mxu2  ;;  %v568_v15 = vrot.slane %v567_v5, 4 }
 0x1da   :  { %v336_v57 = vadd.f32 %v1125_v42, %v335_v55  ;;  %v565_v55 = vrot.slane %v564_v41, 1 }
 0x1db   :  { %v569_v23 = vmax.f32 %v567_v5, %v568_v15  ;;  %v633_v15 = vpop.permute.xlu0 %632 }
 0x1dc   :  { %v349_v63 = vmax.f32 %v336_v57, 0.0  ;;  %v551_v57 = vrot.slane %v550_v45, 1  ;;  %v566_v2 = vmax.f32 %v564_v41, %v565_v55 }
 0x1dd   :  { %v570_v34 = vrot.slane %v569_v23, 2 }
 0x1de   :  { %v542_v1 = vmul.f32 %v521_v58, %v349_v63  ;;  %v559_v63 = vmax.f32 %v557_v39, %v558_v50  ;;  %v552_v4 = vmax.f32 %v550_v45, %v551_v57  ;;  %v652_v12 = vmul.f32 %v623_v54, %v566_v2  ;;  %v905_v54 = vld [vmem:[%s1177_s6 + $0x3] ss:$0 sm:$0xff] }
 0x1df   :  { %v571_v47 = vmax.f32 %v569_v23, %v570_v34 }
 0x1e0   :  { %v574_v7 = vsel %vm216_vm3, %v542_v1, -inf  ;;  %v651_v9 = vmul.f32 %v618_v18, %v559_v63 }
 0x1e1   :  { %v337_v8 = vpop.f32.mrf.mxu2  ;;  %v575_v13 = vrot.slane %v574_v7, 4  ;;  %v572_v58 = vrot.slane %v571_v47, 1 }
 0x1e2   :  { %v338_v10 = vadd.f32 %v1125_v42, %v337_v8  ;;  %v659_v22 = vpack.c.bf16 %v651_v9, %v651_v9 }
 0x1e3   :  { %v576_v25 = vmax.f32 %v574_v7, %v575_v13  ;;  %v573_v5 = vmax.f32 %v571_v47, %v572_v58  ;;  %v650_v13 = vmul.f32 %v1128_v46, %v552_v4 }
 0x1e4   :  { %v350_v14 = vmax.f32 %v338_v10, 0.0 }
 0x1e5   :  { %v577_v36 = vrot.slane %v576_v25, 2  ;;  %v658_v27 = vpack.c.bf16 %v650_v13, %v650_v13 }
 0x1e6   :  { %v543_v21 = vmul.f32 %v526_v17, %v350_v14  ;;  %v653_v14 = vmul.f32 %v628_v62, %v573_v5 }
 0x1e7   :  { %v578_v48 = vmax.f32 %v576_v25, %v577_v36  ;;  %v660_v25 = vpack.c.bf16 %v652_v12, %v652_v12  ;;  %v684_v34 = vunpack.c.l.b16 %v658_v27 }
 0x1e8   :  { %v581_v26 = vsel %vm216_vm3, %v543_v21, -inf  ;;  %v643_v21 = vpop.permute.xlu2 %642  ;;  %v661_v18 = vpack.c.bf16 %v653_v14, %v653_v14 }
 0x1e9   :  { %v582_v29 = vrot.slane %v581_v26, 4  ;;  %v340_v30 = vpop.f32.mrf.mxu2  ;;  %v579_v60 = vrot.slane %v578_v48, 1  ;;  %v686_v46 = vunpack.c.l.b16 %v660_v25 }
 0x1ea   :  { %v341_v32 = vadd.f32 %v1125_v42, %v340_v30  ;;  %v685_v30 = vunpack.c.l.b16 %v659_v22 }
 0x1eb   :  { %v583_v35 = vmax.f32 %v581_v26, %v582_v29  ;;  %v580_v7 = vmax.f32 %v578_v48, %v579_v60  ;;  %v906_v60 = vld [vmem:[%s1177_s6 + $0x4] ss:$0 sm:$0xff] }
 0x1ec   :  { %v351_v37 = vmax.f32 %v341_v32, 0.0  ;;  %v693_v39 = vsel %vm692_vm4, %v685_v30, %v684_v34 }
 0x1ed   :  { %v584_v40 = vrot.slane %v583_v35, 2  ;;  %v654_v20 = vmul.f32 %v633_v15, %v580_v7  ;;  %v695_v44 = vsel %vm694_vm5, %v686_v46, %v693_v39 }
 0x1ee   :  { %v544_v43 = vmul.f32 %v531_v38, %v351_v37  ;;  %v648_v37 = vpop.permute.xlu0 %647 }
 0x1ef   :  { %v585_v51 = vmax.f32 %v583_v35, %v584_v40  ;;  %v662_v29 = vpack.c.bf16 %v654_v20, %v654_v20  ;;  %v687_v35 = vunpack.c.l.b16 %v661_v18 }
 0x1f0   :  { %v588_v49 = vsel %vm216_vm3, %v544_v43, -inf }
 0x1f1   :  { %v589_v52 = vrot.slane %v588_v49, 4  ;;  %v342_v53 = vpop.f32.mrf.mxu2  ;;  %v586_v0 = vrot.slane %v585_v51, 1  ;;  %v688_v38 = vunpack.c.l.b16 %v662_v29  ;;  %v697_v47 = vsel %vm696_vm6, %v687_v35, %v695_v44 }
 0x1f2   :  { %v343_v56 = vadd.f32 %v1125_v42, %v342_v53 }
 0x1f3   :  { %v590_v59 = vmax.f32 %v588_v49, %v589_v52  ;;  %v587_v10 = vmax.f32 %v585_v51, %v586_v0  ;;  %v699_v48 = vsel %vm698_vm7, %v688_v38, %v697_v47 }
 0x1f4   :  { %v352_v61 = vmax.f32 %v343_v56, 0.0 }
 0x1f5   :  { %v591_v1 = vrot.slane %v590_v59, 2  ;;  %v655_v23 = vmul.f32 %v638_v19, %v587_v10 }
 0x1f6   :  { %v545_v3 = vmul.f32 %v536_v24, %v352_v61 }
 0x1f7   :  { %v592_v6 = vmax.f32 %v590_v59, %v591_v1  ;;  %v663_v31 = vpack.c.bf16 %v655_v23, %v655_v23 }
 0x1f8   :  { %v595_v8 = vsel %vm216_vm3, %v545_v3, -inf }
 0x1f9   :  { %v593_v42 = vrot.slane %v592_v6, 1  ;;  %v596_v11 = vrot.slane %v595_v8, 4  ;;  %v689_v40 = vunpack.c.l.b16 %v663_v31 }
 0x1fb   :  { %v594_v16 = vmax.f32 %v592_v6, %v593_v42  ;;  %v597_v17 = vmax.f32 %v595_v8, %v596_v11  ;;  %v701_v50 = vsel %vm700_vm8, %v689_v40, %v699_v48 }
 0x1fd   :  { %v598_v24 = vrot.slane %v597_v17, 2  ;;  %v656_v26 = vmul.f32 %v643_v21, %v594_v16 }
 0x1ff   :  { %v599_v28 = vmax.f32 %v597_v17, %v598_v24  ;;  %v664_v33 = vpack.c.bf16 %v656_v26, %v656_v26 }
 0x201   :  { %v600_v32 = vrot.slane %v599_v28, 1  ;;  %v690_v43 = vunpack.c.l.b16 %v664_v33 }
 0x203   :  { %v601_v36 = vmax.f32 %v599_v28, %v600_v32  ;;  %v703_v51 = vsel %vm702_vm9, %v690_v43, %v701_v50 }
 0x205   :  { %v657_v41 = vmul.f32 %v648_v37, %v601_v36 }
 0x207   :  { %v665_v45 = vpack.c.bf16 %v657_v41, %v657_v41 }
 0x209   :  { %v691_v49 = vunpack.c.l.b16 %v665_v45 }
 0x20b   :  { %v705_v52 = vsel %vm704_vm10, %v691_v49, %v703_v51 }
 0x20c   :  { %v706_v53 = vpack.c.b16 %v705_v52, %v705_v52 }
 0x20e   :  { %868 = vmatmul.msk.bf16.vlgmr.msra.gmra.mxu3 %vm216_vm3, %v706_v53 }
 0x291   :  { %v743_v55 = vpop.f32.mrf.mxu3 }
 0x292   :  { %v744_v56 = vadd.f32 %v905_v54, %v743_v55 }
 0x294   :  { %v747_v57 = vmax.f32 %v744_v56, 0.0 }
 0x296   :  { %v748_v58 = vpack.c.bf16 %v747_v57, %v747_v57 }
 0x298   :  { %873 = vmatmul.msk.bf16.vlgmr.msrb.gmra.mxu3 %vm759_vm11, %v748_v58 }
 0x299   :  { %v745_v59 = vpop.f32.mrf.mxu3 }
 0x31b   :  { %v772_v61 = vpop.f32.mrf.mxu3 }
 0x31c   :  { %v773_v62 = vadd.f32 %v906_v60, %v772_v61 }
 0x31e   :  { %777 = vst.msk [vmem:[%s1178_s7] sm:$0xff] %vm776_vm12, %v773_v62 }
 0x323   :  { %v774_v63 = vpop.f32.mrf.mxu3 }
 0x324   :  { %782 = vsyncpa [#allocation3], 1 }
 0x325   :  { %783 = vsyncpa [#allocation5], 1 }

</bundles_post_ra>
